<compile_context>
chip_gen: v7x
topology: tpu7x:2x2x1
jax: 0.10.0
libtpu: 0.0.40
codegen_flags: <defaults>
</compile_context>

<pallas_src>
import functools

import jax
import jax.numpy as jnp
from jax.experimental import pallas as pl
from jax.experimental.pallas import tpu as pltpu


def _round_up(x, m):
    return (x + m - 1) // m * m


def _largest_tile(total, cap, unit):
    """Largest multiple of `unit` that divides `total` and is <= cap (>= unit)."""
    best = unit
    c = unit
    top = min(cap, total)
    while c <= top:
        if total % c == 0:
            best = c
        c += unit
    return best


def _head_kernel(x_ref, w_ref, b_ref, o_ref, *, tk, w_resident):
    # grid = (batch tiles, K tiles); K (axis 1) is the reduction axis, innermost.
    k = pl.program_id(1)

    @pl.when(k == 0)
    def _init():
        o_ref[...] = jnp.zeros_like(o_ref)

    if w_resident:
        # Whole (Dp, Cp) weight lives in VMEM; slice the current K slab.
        off = pl.multiple_of(k * tk, 128)
        w = w_ref[pl.ds(off, tk), :]
    else:
        w = w_ref[...]

    # (bm, tk) @ (tk, Cp) -> accumulate into the resident f32 output block.
    o_ref[...] += jnp.dot(x_ref[...], w, preferred_element_type=jnp.float32)

    @pl.when(k == pl.num_programs(1) - 1)
    def _finalize():
        logits = o_ref[...] + b_ref[...]               # (bm, Cp) + (1, Cp)
        m = jnp.max(logits, axis=-1, keepdims=True)    # numerically stable softmax
        e = jnp.exp(logits - m)
        denom = jnp.sum(e, axis=-1, keepdims=True)
        o_ref[...] = e / denom                          # exact divide (off critical path)


def classification_head(x, weight, bias):
    """softmax(x.reshape(B, -1) @ weight.T + bias, axis=1).

    x:      (B, S, E) float32
    weight: (C, S*E)  float32   (PyTorch nn.Linear layout)
    bias:   (C,)      float32
    returns (B, C)    float32
    """
    B = x.shape[0]
    x_flat = x.reshape(B, -1).astype(jnp.float32)
    D = x_flat.shape[1]
    C = weight.shape[0]
    assert weight.shape[1] == D

    # --- padded sizes (lane/sublane friendly) -------------------------------
    Dp = _round_up(D, 128)
    Cp = _round_up(C, 128)

    # Batch tile: multiple of 8; >= 2 tiles for larger batches (megacore).
    if B <= 8:
        bm = 8
    elif B <= 256:
        bm = _round_up((B + 1) // 2, 8)
    else:
        bm = 128
    Bp = _round_up(B, bm)

    # K tile: multiple of 128, divides Dp, bounded, >= 2 steps when non-trivial.
    tk = _largest_tile(Dp, min(2048, Dp), 128)
    if Dp // tk < 2 and Dp >= 256:
        tk = _largest_tile(Dp, Dp // 2, 128)

    # --- pad operands (one-time wrapper cost, amortized) --------------------
    x_p = jnp.zeros((Bp, Dp), jnp.float32).at[:B, :D].set(x_flat)
    w_t = jnp.zeros((Dp, Cp), jnp.float32).at[:D, :C].set(weight.T.astype(jnp.float32))
    # Padded classes get a huge negative bias -> exp() == 0 -> softmax unaffected.
    b_p = jnp.full((1, Cp), -1e30, jnp.float32).at[0, :C].set(bias.astype(jnp.float32))

    # Keep the whole weight resident in VMEM when small (no per-batch-tile re-read).
    w_resident = (4 * Dp * Cp) <= (6 * 2 ** 20)
    if w_resident:
        w_spec = pl.BlockSpec((Dp, Cp), lambda b, k: (0, 0))
    else:
        w_spec = pl.BlockSpec((tk, Cp), lambda b, k: (k, 0))

    grid = (Bp // bm, Dp // tk)

    # Explicit VMEM budget (double-buffered tiles) -> vmem_limit_bytes.
    vmem_need = (
        2 * bm * tk * 4
        + (2 * Dp * Cp * 4 if w_resident else 2 * tk * Cp * 4)
        + 2 * bm * Cp * 4
        + 2 * 8 * Cp * 4
    )
    vmem_limit = int(min(max(3 * vmem_need, 16 * 2 ** 20), 48 * 2 ** 20))

    kernel = functools.partial(_head_kernel, tk=tk, w_resident=w_resident)

    out_p = pl.pallas_call(
        kernel,
        out_shape=jax.ShapeDtypeStruct((Bp, Cp), jnp.float32),
        grid_spec=pltpu.PrefetchScalarGridSpec(
            num_scalar_prefetch=0,
            grid=grid,
            in_specs=[
                pl.BlockSpec((bm, tk), lambda b, k: (b, k)),   # x: batch tile x K slab
                w_spec,                                        # weight: resident or K-tiled
                pl.BlockSpec((1, Cp), lambda b, k: (0, 0)),    # bias: resident
            ],
            out_specs=pl.BlockSpec((bm, Cp), lambda b, k: (b, 0)),  # resident accumulator
        ),
        compiler_params=pltpu.CompilerParams(
            dimension_semantics=("parallel", "arbitrary"),
            vmem_limit_bytes=vmem_limit,
        ),
    )(x_p, w_t, b_p)

    return out_p[:B, :C]


if __name__ == "__main__":
    # Small deterministic config: batch=2, seq=8, embed=32 -> D=256, classes=4
    B, S, E, C = 2, 8, 32, 4
    D = S * E

    key = jax.random.PRNGKey(0)
    kx, kw, kb = jax.random.split(key, 3)
    x = jax.random.normal(kx, (B, S, E), dtype=jnp.float32)
    # nn.Linear(D, C): weight (C, D), bias (C,)
    weight = jax.random.normal(kw, (C, D), dtype=jnp.float32) * 0.02
    bias = jax.random.normal(kb, (C,), dtype=jnp.float32) * 0.02

    out = classification_head(x, weight, bias)
    out = jax.block_until_ready(out)

    # Pure-JAX reference (high-precision matmul for a fair comparison)
    logits_ref = jnp.dot(x.reshape(B, D), weight.T,
                         precision=jax.lax.Precision.HIGHEST) + bias
    ref = jax.nn.softmax(logits_ref, axis=1)

    assert out.shape == (B, C)
    assert jnp.allclose(out, ref, atol=1e-4, rtol=1e-4), "mismatch vs reference"
    assert jnp.allclose(jnp.sum(out, axis=1), 1.0, atol=1e-5)

    print("KERNEL_OK")
</pallas_src>

<mosaic_0001>
module attributes {stable_mosaic.version = 11 : i64} {
  func.func @_head_kernel(%arg0: i32, %arg1: i32, %arg2: memref<8x128xf32, #tpu.memory_space<vmem>>, %arg3: memref<256x128xf32, #tpu.memory_space<vmem>>, %arg4: memref<1x128xf32, #tpu.memory_space<vmem>>, %arg5: memref<8x128xf32, #tpu.memory_space<vmem>>) attributes {dimension_semantics = [#tpu.dimension_semantics<parallel>, #tpu.dimension_semantics<arbitrary>], iteration_bounds = array<i64: 1, 2>, scalar_prefetch = 0 : i64, scratch_operands = 0 : i64, tpu.core_type = #tpu.core_type<tc>, window_params = [{transform_indices = @transform_0, window_bounds = array<i64: 8, 128>}, {pipeline_mode = #tpu.pipeline_mode<synchronous>, transform_indices = @transform_1, window_bounds = array<i64: 256, 128>}, {pipeline_mode = #tpu.pipeline_mode<synchronous>, transform_indices = @transform_2, window_bounds = array<i64: 1, 128>}, {transform_indices = @transform_3, window_bounds = array<i64: 8, 128>}]} {
    %c0_i32 = arith.constant 0 : i32
    %0 = arith.cmpi eq, %arg1, %c0_i32 : i32
    %1 = arith.extui %0 : i1 to i32
    %c0_i32_0 = arith.constant 0 : i32
    %2 = arith.cmpi ne, %1, %c0_i32_0 : i32
    scf.if %2 {
      %cst_8 = arith.constant 0.000000e+00 : f32
      %15 = vector.broadcast %cst_8 : f32 to vector<8x128xf32>
      %c0_9 = arith.constant 0 : index
      %c0_10 = arith.constant 0 : index
      %16 = vector.load %arg5[%c0_9, %c0_10] : memref<8x128xf32, #tpu.memory_space<vmem>>, vector<8x128xf32>
      tpu.vector_store %arg5[%c0_9, %c0_10], %15 {strides = array<i32>} : memref<8x128xf32, #tpu.memory_space<vmem>>, vector<8x128xf32>,
    } else {
    }
    %c128_i32 = arith.constant 128 : i32
    %3 = arith.muli %arg1, %c128_i32 : i32
    %4 = tpu.assume_multiple %3, 128 : i32
    %5 = arith.index_cast %4 : i32 to index
    %c0 = arith.constant 0 : index
    %6 = vector.load %arg3[%5, %c0] : memref<256x128xf32, #tpu.memory_space<vmem>>, vector<128x128xf32>
    %c0_1 = arith.constant 0 : index
    %c0_2 = arith.constant 0 : index
    %7 = vector.load %arg5[%c0_1, %c0_2] : memref<8x128xf32, #tpu.memory_space<vmem>>, vector<8x128xf32>
    %c0_3 = arith.constant 0 : index
    %c0_4 = arith.constant 0 : index
    %8 = vector.load %arg2[%c0_3, %c0_4] : memref<8x128xf32, #tpu.memory_space<vmem>>, vector<8x128xf32>
    %cst = arith.constant dense<0.000000e+00> : vector<8x128xf32>
    %9 = tpu.matmul %8, %6, %cst {dimension_numbers = #tpu.dot_dimension_numbers<[1], [0], [0], [1], [0, 0, 1, 1], [], []>} : vector<8x128xf32>, vector<128x128xf32>, vector<8x128xf32> -> vector<8x128xf32>
    %10 = arith.addf %7, %9 : vector<8x128xf32>
    %c0_5 = arith.constant 0 : index
    %c0_6 = arith.constant 0 : index
    %11 = vector.load %arg5[%c0_5, %c0_6] : memref<8x128xf32, #tpu.memory_space<vmem>>, vector<8x128xf32>
    tpu.vector_store %arg5[%c0_5, %c0_6], %10 {strides = array<i32>} : memref<8x128xf32, #tpu.memory_space<vmem>>, vector<8x128xf32>,
    %c1_i32 = arith.constant 1 : i32
    %12 = arith.cmpi eq, %arg1, %c1_i32 : i32
    %13 = arith.extui %12 : i1 to i32
    %c0_i32_7 = arith.constant 0 : i32
    %14 = arith.cmpi ne, %13, %c0_i32_7 : i32
    scf.if %14 {
      %c0_8 = arith.constant 0 : index
      %c0_9 = arith.constant 0 : index
      %15 = vector.load %arg5[%c0_8, %c0_9] : memref<8x128xf32, #tpu.memory_space<vmem>>, vector<8x128xf32>
      %c0_10 = arith.constant 0 : index
      %c0_11 = arith.constant 0 : index
      %16 = vector.load %arg4[%c0_10, %c0_11] : memref<1x128xf32, #tpu.memory_space<vmem>>, vector<1x128xf32>
      %17 = vector.broadcast %16 : vector<1x128xf32> to vector<8x128xf32>
      %18 = arith.addf %15, %17 : vector<8x128xf32>
      %cst_12 = arith.constant dense<0xFF800000> : vector<8xf32>
      %19 = vector.multi_reduction <maximumf>, %18, %cst_12 [1] : vector<8x128xf32> to vector<8xf32>
      %20 = vector.shape_cast %19 : vector<8xf32> to vector<8x1xf32>
      %21 = vector.broadcast %20 : vector<8x1xf32> to vector<8x128xf32>
      %22 = arith.subf %18, %21 : vector<8x128xf32>
      %23 = math.exp %22 : vector<8x128xf32>
      %cst_13 = arith.constant dense<0.000000e+00> : vector<8xf32>
      %24 = vector.multi_reduction <add>, %23, %cst_13 [1] : vector<8x128xf32> to vector<8xf32>
      %25 = vector.shape_cast %24 : vector<8xf32> to vector<8x1xf32>
      %26 = vector.broadcast %25 : vector<8x1xf32> to vector<8x128xf32>
      %27 = arith.divf %23, %26 : vector<8x128xf32>
      %c0_14 = arith.constant 0 : index
      %c0_15 = arith.constant 0 : index
      %28 = vector.load %arg5[%c0_14, %c0_15] : memref<8x128xf32, #tpu.memory_space<vmem>>, vector<8x128xf32>
      tpu.vector_store %arg5[%c0_14, %c0_15], %27 {strides = array<i32>} : memref<8x128xf32, #tpu.memory_space<vmem>>, vector<8x128xf32>,
    } else {
    }
    return
  }
  func.func @transform_0(%arg0: i32, %arg1: i32) -> (i32, i32) {
    %c0_i32 = arith.constant 0 : i32
    return %arg0, %arg1 : i32, i32
  }
  func.func @transform_1(%arg0: i32, %arg1: i32) -> (i32, i32) {
    %c0_i32 = arith.constant 0 : i32
    %c0_i32_0 = arith.constant 0 : i32
    %c0_i32_1 = arith.constant 0 : i32
    return %c0_i32, %c0_i32_0 : i32, i32
  }
  func.func @transform_2(%arg0: i32, %arg1: i32) -> (i32, i32) {
    %c0_i32 = arith.constant 0 : i32
    %c0_i32_0 = arith.constant 0 : i32
    %c0_i32_1 = arith.constant 0 : i32
    return %c0_i32, %c0_i32_0 : i32, i32
  }
  func.func @transform_3(%arg0: i32, %arg1: i32) -> (i32, i32) {
    %c0_i32 = arith.constant 0 : i32
    %c0_i32_0 = arith.constant 0 : i32
    return %arg0, %c0_i32 : i32, i32
  }
}

</mosaic_0001>

<bundles_post_ra>
// kernel: tpu_custom_call.1
= control target key start
LH: loop header
LB: loop body
LE: loop exit
PB: predicated region body
PF: predicated region fallthrough
CT: control target
= control target key end

     0   :  { %8 = vsyncpa [#allocation3], 0  ;;  %s972_s0 = inlined_call_operand.hbm [shape: f32[8,256], index: 0, kind: input, shape index: {}]   ;;  %s973_s1 = inlined_call_operand.hbm [shape: f32[256,128], index: 1, kind: input, shape index: {}]   ;;  %s974_s2 = inlined_call_operand.vmem [shape: f32[1,128], index: 2, kind: input, shape index: {}]   ;;  %s975_s3 = inlined_call_operand.hbm [shape: f32[8,128], index: 3, kind: output, shape index: {}]  }
   0x1   :  { %10 = vsyncpa [#allocation3 + $0x1], 0 }
   0x2   :  { %11 = vsyncpa [#allocation6], 0 }
   0x3   :  { %12 = vsyncpa [#allocation4], 0  ;;  %s763_s12 = smov 0   ;;  %s765_s13 = smov 0  }
   0x4   :  { %s767_s14 = smov 0   ;;  %s769_s15 = smov 0  }
   0x5   :  { %s771_s16 = smov 0   ;;  %s773_s17 = smov 0  }
   0x6 LB: > { %s414_s18 = sadd.s32 4294967295, %s732_s17   ;;  %p52_p0 = scmp.ne.s32.totalorder %s716_s13, %s712_s12  ;;  %s732_s17 = sphi %s773_s17, %s18_s17   ;;  %s728_s16 = sphi %s771_s16, %s993_s16   ;;  %s724_s15 = sphi %s769_s15, %s992_s15   ;;  %s720_s14 = sphi %s767_s14, %s991_s14   ;;  %s716_s13 = sphi %s765_s13, %s990_s13   ;;  %s712_s12 = sphi %s763_s12, %s989_s12  }
   0x7   : > { %p795_p1 = scmp.eq.s32.totalorder %s414_s18, 0  ;;  %p415_p2 = scmp.ge.s32.totalorder %s732_s17, 1 }
   0x8   : > { %p131_p3 = scmp.lt.s32.totalorder %s732_s17, 3  ;;  %s734_s22 = smov [#allocation5]  }
   0x9   : > { %s980_s19 = scalar_select %p795_p1, 1, 0 }
   0xa   : > { %p803_p4 = por %p795_p1, %p52_p0  ;;  %p807_p5 = pnand %p415_p2, %p131_p3 }
   0xb   : > { %s143_s23 = sshll.u32 %s734_s22, 4  ;;  %s27_s25 = sadd.s32 1, %s728_s16  ;;  %s144_s23 = int_to_ptr.vmem [resolvable:$true] %s143_s23 }
   0xc   : > { %s981_s20 = scalar_select %p803_p4, 1, 0 }
   0xd   : > { %s982_s21 = scalar_select %p807_p5, 1, 0 }
   0xe   : > { %p517_p6 = pneg %p807_p5  ;;  %s590_s28 = scalar_lea.hbm %s973_s1, 4096 }
   0xf   : > { %p591_p8 = scmp.ne.s32.totalorder %s973_s1, %s590_s28  ;;  %p597_p12 = scmp.lt.u32.totalorder %s590_s28, %s973_s1 }
  0x10   : > { %p815_p7 = pnand %p517_p6, %p795_p1 }
  0x12   : > { %p592_p9 = pneg %p815_p7 }
  0x14   : > { %p593_p10 = pnand %p592_p9, %p591_p8 }
  0x16   : > { %p594_p11 = pneg %p593_p10 }
  0x18   : > { %p599_p13 = pnand %p597_p12, %p594_p11 }
  0x1a   : > { %602 = shalt.err (!%p599_p13)
}
  0x1b   : > { %s603_s6 = scalar_lea.vmem %s144_s23, 4096  ;;  %p611_p6 = scmp.lt.s32.totalorder %s144_s23, %s144_s23 }
  0x1c   : > { %p604_p0 = scmp.ne.s32.totalorder %s144_s23, %s603_s6  ;;  %p612_p1 = scmp.lt.s32.totalorder %s603_s6, %s603_s6 }
  0x1e   : > { %p606_p2 = pnand %p604_p0, %p592_p9  ;;  %p613_p4 = por %p612_p1, %p611_p6 }
  0x20   : > { %p607_p3 = pneg %p606_p2 }
  0x22   : > { %p614_p5 = pnand %p613_p4, %p607_p3 }
  0x24   : > { %617 = shalt.err (!%p614_p5)
}
  0x25   : > { %s735_s7 = smov 128   ;;  %s736_s8 = smov 8  }
  0x26   : > { %520 = dma.hbm_to_vmem [thread:$0]  (!%p815_p7), %s973_s1, 4096, %s144_s23, [#allocation6], %s735_s7, %s735_s7, %s736_s8  }
  0x27   : > { %p28_p1 = scmp.ge.s32.totalorder %s27_s25, 2  ;;  %s39_s11 = sadd.s32 1, %s720_s14 }
  0x28   : > { %p46_p4 = scmp.ne.s32.totalorder %s720_s14, %s716_s13  ;;  %p47_p5 = scmp.eq.s32.totalorder %s732_s17, 0 }
  0x29   : > { %s995_s25 = smov (%p28_p1, %s27_s25), 0  ;;  %p526_p9 = scmp.lt.s32.totalorder %s732_s17, 2 }
  0x2a   : > { %p48_p8 = por %p47_p5, %p46_p4  ;;  %s35_s12 = ssub.s32 %s728_s16, %s995_s25 }
  0x2b   : > { %s160_s22 = sand.u32 1, %s720_s14   ;;  %p37_p10 = scmp.eq.s32.totalorder %s35_s12, 0 }
  0x2c   : > { %s418_s26 = sshll.u32 %s160_s22, 3  ;;  %s419_s27 = sshll.u32 %s728_s16, 7 }
  0x2d   : > { %s848_s28 = scalar_select %p37_p10, %s720_s14, %s39_s11  }
  0x2e   : > { %s853_s23 = scalar_lea.hbm %s972_s0, %s419_s27  ;;  %s164_s30 = scalar_lea.vmem [#allocation2], %s418_s26 }
  0x2f   : > { %s173_s4 = sshll.u32 %s164_s30, 4  ;;  %p855_p7 = pnand %p526_p9, %p48_p8  ;;  %s859_s4 = int_to_ptr.vmem [resolvable:$true] %s173_s4 }
  0x30   : > { %s161_s6 = scalar_lea.sflag [#allocation3], %s160_s22  ;;  %s618_s7 = scalar_lea.hbm %s853_s23, 128 }
  0x31   : > { %p619_p11 = scmp.ne.s32.totalorder %s853_s23, %s618_s7  ;;  %p620_p12 = pneg %p855_p7 }
  0x32   : > { %s623_s10 = scalar_lea.hbm %s972_s0, 256  ;;  %p624_p2 = scmp.lt.u32.totalorder %s853_s23, %s972_s0 }
  0x33   : > { %p621_p13 = pnand %p620_p12, %p619_p11  ;;  %p625_p3 = scmp.lt.u32.totalorder %s623_s10, %s618_s7 }
  0x34   : > { %p627_p1 = scmp.lt.u32.totalorder %s618_s7, %s853_s23 }
  0x35   : > { %p622_p0 = pneg %p621_p13  ;;  %p626_p6 = por %p625_p3, %p624_p2 }
  0x37   : > { %p628_p4 = por %p627_p1, %p626_p6 }
  0x39   : > { %p629_p5 = pnand %p628_p4, %p622_p0 }
  0x3b   : > { %632 = shalt.err (!%p629_p5)
}
  0x3c   : > { %s633_s22 = scalar_lea.vmem %s859_s4, 128  ;;  %s737_s26 = smov [#allocation2]  }
  0x3d   : > { %p634_p8 = scmp.ne.s32.totalorder %s859_s4, %s633_s22  ;;  %s638_s27 = sshll.u32 %s737_s26, 4  ;;  %s639_s27 = int_to_ptr.vmem [resolvable:$false] %s638_s27 }
  0x3e   : > { %s640_s24 = scalar_lea.vmem %s639_s27, 256  ;;  %p641_p11 = scmp.lt.s32.totalorder %s859_s4, %s639_s27 }
  0x3f   : > { %p636_p9 = pnand %p634_p8, %p620_p12  ;;  %p642_p13 = scmp.lt.s32.totalorder %s640_s24, %s633_s22 }
  0x41   : > { %p637_p10 = pneg %p636_p9  ;;  %p643_p2 = por %p642_p13, %p641_p11 }
  0x43   : > { %p644_p3 = pnand %p643_p2, %p637_p10 }
  0x45   : > { %647 = shalt.err (!%p644_p3)
}
  0x46   : > { %524 = dma.hbm_to_vmem [thread:$0]  (!%p855_p7), %s853_s23, 128, %s859_s4, %s161_s6  }
  0x47   : > { %p985_p0 = scmp.ne.s32.totalorder %s982_s21, 0 }
  0x48   : > { %s184_s29 = sand.u32 (!%p985_p0), 1, %s716_s13   ;;  %p986_p12 = scmp.ne.s32.totalorder (!%p985_p0), %s981_s20, 0 }
  0x49   : > { %182 = sbr.rel (%p985_p0) target bundleno = 691 (0x2b3), region = 32  ;;  %s889_s30 = sshll.u32 (!%p985_p0), %s184_s29, 3 }
  0x4a   : > { %s185_s7 = scalar_lea.sflag (!%p985_p0), [#allocation3], %s184_s29  ;;  %s188_s8 = scalar_lea.vmem (!%p985_p0), [#allocation2], %s889_s30 }
  0x50   : > { %699 = dma.done.wait (%p986_p12), %s185_s7, 128  }
  0x51   : > { %701 = vsyncadd (%p986_p12), %s185_s7, 4294967168  ;;  %p987_p6 = scmp.ne.s32.totalorder %s980_s19, 0 }
  0x53   : > { %703 = dma.done.wait (%p987_p6), [#allocation6], 4096  }
  0x54   : > { %705 = vsyncadd (%p987_p6), [#allocation6], 4294963200  ;;  %p423_p7 = scmp.ne.s32.totalorder %s724_s15, 0 }
  0x55   : > { %v738_v0 = vmov (!%p423_p7), 0.0  }
  0x56   : > { %213 = sbr.rel (%p423_p7) target bundleno = 93 (0x5d), region = 44  ;;  %214 = vst [vmem:[#allocation7] sm:$0xff] (!%p423_p7), %v738_v0 }
  0x5d PF: > { %s424_s21 = sshll.u32 %s724_s15, 7  ;;  %v739_v1 = vmov 0.0|0.0   ;;  %vm740_vm0 = vmmov 0   ;;  %v741_v2 = vmov 0.0   ;;  %v234_v27 = vld [vmem:[%s188_s8] sm:$0xff]  ;;  %v233_v28 = vld [vmem:[#allocation7] sm:$0xff] }
  0x5e   : > { %483 = vmatprep.subr.bf16.mxu0 %v739_v1  ;;  %480 = vmatprep.mubr.msk.f32.mxu0 %vm740_vm0, %v741_v2  ;;  %s902_s20 = scalar_lea.vmem [#allocation5], %s424_s21  ;;  %p425_p1 = scmp.ne.s32.totalorder %s724_s15, 1 }
  0x5f   : > { %v217_v3 = vld [vmem:[%s902_s20] sm:$0xff]  ;;  %v218_v4 = vld [vmem:[%s902_s20 + $0x8] sm:$0xff]  ;;  %v219_v5 = vld [vmem:[%s902_s20 + $0x10] sm:$0xff] }
  0x60   : > { %v484_v6 = vpack.c.bf16 %v218_v4, %v217_v3  ;;  %v220_v7 = vld [vmem:[%s902_s20 + $0x18] sm:$0xff]  ;;  %v221_v9 = vld [vmem:[%s902_s20 + $0x20] sm:$0xff]  ;;  %v222_v10 = vld [vmem:[%s902_s20 + $0x28] sm:$0xff] }
  0x61   : > { %v487_v8 = vpack.c.bf16 %v220_v7, %v219_v5  ;;  %v490_v11 = vpack.c.bf16 %v222_v10, %v221_v9  ;;  %v223_v12 = vld [vmem:[%s902_s20 + $0x30] sm:$0xff]  ;;  %v224_v13 = vld [vmem:[%s902_s20 + $0x38] sm:$0xff]  ;;  %v225_v15 = vld [vmem:[%s902_s20 + $0x40] sm:$0xff] }
  0x62   : > { %485 = vmatpush3.bf16.msra.mxu0 %v484_v6  ;;  %v493_v14 = vpack.c.bf16 %v224_v13, %v223_v12  ;;  %v226_v16 = vld [vmem:[%s902_s20 + $0x48] sm:$0xff]  ;;  %v227_v18 = vld [vmem:[%s902_s20 + $0x50] sm:$0xff]  ;;  %v228_v19 = vld [vmem:[%s902_s20 + $0x58] sm:$0xff] }
  0x63   : > { %486 = vmatprep.subr.bf16.mxu0 %v739_v1  ;;  %v496_v17 = vpack.c.bf16 %v226_v16, %v225_v15  ;;  %v499_v20 = vpack.c.bf16 %v228_v19, %v227_v18  ;;  %v229_v21 = vld [vmem:[%s902_s20 + $0x60] sm:$0xff]  ;;  %v230_v22 = vld [vmem:[%s902_s20 + $0x68] sm:$0xff]  ;;  %v231_v24 = vld [vmem:[%s902_s20 + $0x70] sm:$0xff] }
  0x64   : > { %v502_v23 = vpack.c.bf16 %v230_v22, %v229_v21  ;;  %v232_v25 = vld [vmem:[%s902_s20 + $0x78] sm:$0xff]  ;;  %v426_v33 = vld [vmem:[%s974_s2] ss:$0 sm:$0xff] (!%p425_p1) }
  0x65   : > { %v505_v26 = vpack.c.bf16 %v232_v25, %v231_v24 }
  0x66   : > { %488 = vmatpush3.bf16.msra.mxu0 %v487_v8 }
  0x67   : > { %489 = vmatprep.subr.bf16.mxu0 %v739_v1 }
  0x6a   : > { %491 = vmatpush3.bf16.msra.mxu0 %v490_v11 }
  0x6b   : > { %492 = vmatprep.subr.bf16.mxu0 %v739_v1 }
  0x6e   : > { %494 = vmatpush3.bf16.msra.mxu0 %v493_v14 }
  0x6f   : > { %495 = vmatprep.subr.bf16.mxu0 %v739_v1 }
  0x72   : > { %497 = vmatpush3.bf16.msra.mxu0 %v496_v17 }
  0x73   : > { %498 = vmatprep.subr.bf16.mxu0 %v739_v1 }
  0x76   : > { %500 = vmatpush3.bf16.msra.mxu0 %v499_v20 }
  0x77   : > { %501 = vmatprep.subr.bf16.mxu0 %v739_v1 }
  0x7a   : > { %503 = vmatpush3.bf16.msra.mxu0 %v502_v23 }
  0x7b   : > { %504 = vmatprep.subr.bf16.mxu0 %v739_v1 }
  0x7e   : > { %506 = vmatpush3.bf16.msra.mxu0 %v505_v26 }
  0x81   : > { %481 = vmatmul.mubr.f32.vlgmr.msra.gmra.mrb[0].mxu0 %v234_v27 }
 0x151   : > { %310 = sbr.rel (%p425_p1) target bundleno = 666 (0x29a), region = 48 }
 0x154   : > { %v301_v29 = vpop.f32.mrb[0].mxu0 }
 0x155   : > { %v305_v30 = vadd.f32 %v301_v29, %v233_v28  ;;  %v482_v31 = vpop.f32.mrb[1].mxu0 }
 0x157   : > { %306 = vst [vmem:[#allocation7] sm:$0xff] %v305_v30 }
 0x15e   : > { %v311_v32 = vld [vmem:[#allocation7] sm:$0xff] }
 0x15f   : > { %v319_v34 = vadd.f32 %v426_v33, %v311_v32 }
 0x161   : > { %320 = vmax.xlane.f32.xlu0 %v319_v34 }
 0x1ee   : > { %v321_v35 = vpop.xlane.xlu0 %320 }
 0x1ef   : > { %v322_v36 = vsub.f32 %v319_v34, %v321_v35 }
 0x1f1   : > { %v323_v37 = vmul.f32 1.442695, %v322_v36 }
 0x1f3   : > { %586 = vpow2.f32 %v323_v37 }
 0x1fd   : > { %v587_v38 = vpop.eup %586 }
 0x1fe   : > { %325 = vadd.xlane.f32.xlu0 %v587_v38 }
 0x28b   : > { %v326_v39 = vpop.xlane.xlu0 %325 }
 0x28c   : > { %588 = vrcp.f32 %v326_v39 }
 0x296   : > { %v589_v40 = vpop.eup %588 }
 0x297   : > { %v328_v41 = vmul.f32 %v589_v40, %v587_v38 }
 0x299   : > { %329 = vst [vmem:[#allocation7] sm:$0xff] %v328_v41 }
 0x29a PF: > { %p928_p4 = scmp.eq.s32.totalorder %s414_s18, 1  ;;  %s742_s4 = smov [#allocation7]  }
 0x29b   : > { %s339_s5 = sshll.u32 %s742_s4, 4  ;;  %s340_s5 = int_to_ptr.vmem [resolvable:$true] %s339_s5 }
 0x29c   : > { %s648_s6 = scalar_lea.vmem %s340_s5, 128  ;;  %p655_p10 = scmp.lt.s32.totalorder %s340_s5, %s340_s5 }
 0x29d   : > { %p649_p5 = scmp.ne.s32.totalorder %s340_s5, %s648_s6  ;;  %p656_p11 = scmp.lt.s32.totalorder %s648_s6, %s648_s6 }
 0x29f   : > { %p650_p8 = pnand %p649_p5, %p928_p4  ;;  %p657_p13 = por %p656_p11, %p655_p10 }
 0x2a1   : > { %p651_p9 = pneg %p650_p8 }
 0x2a3   : > { %p658_p2 = pnand %p657_p13, %p651_p9 }
 0x2a5   : > { %661 = shalt.err (!%p658_p2)
}
 0x2a6   : > { %s662_s18 = scalar_lea.hbm %s975_s3, 128 }
 0x2a7   : > { %p663_p3 = scmp.ne.s32.totalorder %s975_s3, %s662_s18  ;;  %p668_p6 = scmp.lt.u32.totalorder %s662_s18, %s975_s3 }
 0x2a9   : > { %p664_p0 = pnand %p663_p3, %p928_p4 }
 0x2ab   : > { %p665_p12 = pneg %p664_p0 }
 0x2ad   : > { %p670_p7 = pnand %p668_p6, %p665_p12 }
 0x2af   : > { %673 = shalt.err (!%p670_p7)
}
 0x2b0   : > { %514 = dma.vmem_to_hbm [thread:$0]  (%p928_p4), %s340_s5, 128, %s975_s3, [#allocation4]  }
 0x2b1   : > { %707 = dma.done.wait (%p928_p4), [#allocation4], 128  }
 0x2b2   : > { %709 = vsyncadd (%p928_p4), [#allocation4], 4294967168 }
 0x2b3 PF: > { %s18_s17 = sadd.s32 1, %s732_s17   ;;  %s989_s12 = smov %s716_s13 }
 0x2b4   : > { %p15_p1 = scmp.ge.s32.totalorder %s18_s17, 4   ;;  %s990_s13 = smov %s720_s14 }
 0x2b5   : > { %s991_s14 = smov %s848_s28  ;;  %s992_s15 = smov %s728_s16 }
 0x2b6   : > { %s993_s16 = smov %s995_s25  ;;  %17 = sbr.rel (!%p15_p1) target bundleno = 6 (0x6), region = 83 }
 0x2bd   :  { %352 = vsyncpa [#allocation3], 1 }
 0x2be   :  { %354 = vsyncpa [#allocation3 + $0x1], 1 }
 0x2bf   :  { %355 = vsyncpa [#allocation6], 1 }
 0x2c0   :  { %356 = vsyncpa [#allocation4], 1 }
 0x2c1   :  { %358 = vsyncpa [#allocation4 + $0x1], 1 }

</bundles_post_ra>
